<compile_context>
chip_gen: v5e
topology: v5e:2x2
jax: 0.10.0
libtpu: 0.0.40
codegen_flags: <defaults>
</compile_context>

<pallas_src>
import functools
import math

import jax
import jax.numpy as jnp
from jax.experimental import pallas as pl
from jax.experimental.pallas import tpu as pltpu


def _normalize_rows(v):
    # F.normalize(dim=-1, eps=1e-12):  v / max(||v||, 1e-12)
    sumsq = jnp.sum(v * v, axis=-1, keepdims=True)
    return v * jax.lax.rsqrt(jnp.maximum(sumsq, jnp.float32(1e-24)))


def _cosine_block(x, w, use_bf16):
    # cos_theta tile = xnorm @ wnorm.T, contracting the lane axis of BOTH
    # operands (no materialized transpose).
    xn = _normalize_rows(x)
    wn = _normalize_rows(w)
    if use_bf16:
        xn = xn.astype(jnp.bfloat16)
        wn = wn.astype(jnp.bfloat16)
    return jax.lax.dot_general(
        xn, wn,
        dimension_numbers=(((1,), (1,)), ((), ())),
        preferred_element_type=jnp.float32)  # [B, TN] f32


def _arcface_train_kernel(x_ref, w_ref, tgt_ref, out_ref, *,
                          cos_m, sin_m, s, min_cos, max_cos, block_n,
                          use_bf16):
    j = pl.program_id(0)
    x = x_ref[...].astype(jnp.float32)            # [B, nfeat]
    w = w_ref[...].astype(jnp.float32)            # [TN, nfeat]

    cos_theta = _cosine_block(x, w, use_bf16)     # [B, TN] f32

    tgt = tgt_ref[...]                            # [B, 1] int32
    cls_ids = jax.lax.broadcasted_iota(jnp.int32, cos_theta.shape, 1) \
        + j * jnp.int32(block_n)                  # global class ids
    mask = cls_ids == tgt                         # [B, TN] bool

    # gather(1, target) via masked reduction (zero for tiles w/o the target).
    cos_yi = jnp.sum(jnp.where(mask, cos_theta, jnp.float32(0.0)),
                     axis=-1, keepdims=True)      # [B, 1]
    cos_yi = jnp.clip(cos_yi, jnp.float32(min_cos), jnp.float32(max_cos))
    # cos(acos(c) + m) = c*cos(m) - sqrt(1-c^2)*sin(m)
    sin_yi = jnp.sqrt(jnp.maximum(1.0 - cos_yi * cos_yi, 0.0))
    cos_yi_margin = cos_yi * jnp.float32(cos_m) - sin_yi * jnp.float32(sin_m)
    delta = cos_yi_margin - cos_yi                # [B, 1]

    out = jnp.float32(s) * jnp.where(mask, cos_theta + delta, cos_theta)
    out_ref[...] = out.astype(out_ref.dtype)


def _arcface_eval_kernel(x_ref, w_ref, out_ref, *, s, use_bf16):
    x = x_ref[...].astype(jnp.float32)
    w = w_ref[...].astype(jnp.float32)
    cos_theta = _cosine_block(x, w, use_bf16)
    out_ref[...] = (jnp.float32(s) * cos_theta).astype(out_ref.dtype)


def _choose_class_tile(nclass, nfeat, B, budget_bytes=24 << 20):
    """Largest class-tile TN (multiple of 128, divisor of nclass) fitting a
    conservative double-buffered VMEM budget; small/ragged nclass -> one block."""
    if nclass % 128 != 0:
        return nclass
    resident = B * nfeat * 4 + B * 4              # x + target
    for cand in (4096, 2048, 1024, 512, 256, 128):
        if cand > nclass or nclass % cand != 0:
            continue
        need = resident + 2 * cand * nfeat * 4 + 2 * B * cand * 4
        if need <= budget_bytes:
            return cand
    return 128


def arc_linear_forward(x, W, target=None, *, margin=0.5, s=30.0,
                       training=True, use_bf16_matmul=True, block_n=None):
    """ArcLinear.forward.  x: [B, nfeat] f32, W: [nclass, nfeat] f32,
    target: [B] int (required if training).  Returns [B, nclass] f32."""
    B, nfeat = x.shape
    nclass, nfeat_w = W.shape
    assert nfeat == nfeat_w
    eps = 0.0001

    if block_n is None:
        block_n = _choose_class_tile(nclass, nfeat, B)
    assert block_n == nclass or nclass % block_n == 0

    grid = (pl.cdiv(nclass, block_n),)
    out_shape = jax.ShapeDtypeStruct((B, nclass), jnp.float32)

    # Double-buffered W + out tiles, resident x/target, plus slack.
    vmem_est = (B * nfeat * 4 + B * 4
                + 2 * block_n * nfeat * 4 + 2 * B * block_n * 4)
    compiler_params = pltpu.CompilerParams(
        dimension_semantics=("parallel",),
        vmem_limit_bytes=int(min(max(2 * vmem_est, 32 << 20), 48 << 20)),
    )

    x_spec = pl.BlockSpec((B, nfeat), lambda j: (0, 0))       # resident
    w_spec = pl.BlockSpec((block_n, nfeat), lambda j: (j, 0))  # streamed once
    out_spec = pl.BlockSpec((B, block_n), lambda j: (0, j))

    if training:
        assert target is not None, "target required in training mode"
        tgt = target.astype(jnp.int32).reshape(B, 1)
        tgt_spec = pl.BlockSpec((B, 1), lambda j: (0, 0))      # resident
        kernel = functools.partial(
            _arcface_train_kernel,
            cos_m=math.cos(float(margin)), sin_m=math.sin(float(margin)),
            s=float(s), min_cos=eps - 1.0, max_cos=1.0 - eps,
            block_n=block_n, use_bf16=use_bf16_matmul)
        return pl.pallas_call(
            kernel,
            out_shape=out_shape,
            grid=grid,
            in_specs=[x_spec, w_spec, tgt_spec],
            out_specs=out_spec,
            compiler_params=compiler_params,
        )(x, W, tgt)
    else:
        kernel = functools.partial(_arcface_eval_kernel, s=float(s),
                                   use_bf16=use_bf16_matmul)
        return pl.pallas_call(
            kernel,
            out_shape=out_shape,
            grid=grid,
            in_specs=[x_spec, w_spec],
            out_specs=out_spec,
            compiler_params=compiler_params,
        )(x, W)


def _reference(x, W, target, margin, s, training):
    # Pure-JAX reference of the PyTorch forward.
    eps = 0.0001
    xn = x / jnp.maximum(jnp.linalg.norm(x, axis=-1, keepdims=True), 1e-12)
    wn = W / jnp.maximum(jnp.linalg.norm(W, axis=-1, keepdims=True), 1e-12)
    cos = xn @ wn.T
    if not training:
        return s * cos
    tgt = target.astype(jnp.int32)
    cos_yi = jnp.take_along_axis(cos, tgt[:, None], axis=1)
    cos_yi = jnp.clip(cos_yi, eps - 1.0, 1.0 - eps)
    cos_yi_m = jnp.cos(jnp.arccos(cos_yi) + margin)
    one_hot = jax.nn.one_hot(tgt, cos.shape[1], dtype=cos.dtype)
    return s * (cos + one_hot * (cos_yi_m - cos_yi))


def _make_inputs(key, B, nfeat, nclass):
    kx, kw, kt = jax.random.split(key, 3)
    x = jax.random.normal(kx, (B, nfeat), dtype=jnp.float32)
    bound = (6.0 / (nfeat + nclass)) ** 0.5       # xavier_uniform_ for (nclass, nfeat)
    W = jax.random.uniform(kw, (nclass, nfeat), dtype=jnp.float32,
                           minval=-bound, maxval=bound)
    target = jax.random.randint(kt, (B,), 0, nclass, dtype=jnp.int32)
    return x, W, target


if __name__ == "__main__":
    margin, scale = 0.5, 30.0
    key = jax.random.PRNGKey(0)
    k1, k2 = jax.random.split(key)

    # Case 1: tiny shapes (single class block), f32 matmul -> tight tolerance.
    B, nfeat, nclass = 8, 32, 16
    x, W, target = _make_inputs(k1, B, nfeat, nclass)
    out_tr = arc_linear_forward(x, W, target, margin=margin, s=scale,
                                training=True, use_bf16_matmul=False)
    out_ev = arc_linear_forward(x, W, margin=margin, s=scale,
                                training=False, use_bf16_matmul=False)
    jax.block_until_ready((out_tr, out_ev))
    assert jnp.allclose(out_tr, _reference(x, W, target, margin, scale, True),
                        atol=1e-4, rtol=1e-4)
    assert jnp.allclose(out_ev, _reference(x, W, target, margin, scale, False),
                        atol=1e-4, rtol=1e-4)

    # Case 2: shapes that exercise class tiling (forced TN=256 -> grid of 2).
    B2, nfeat2, nclass2 = 64, 128, 512
    x2, W2, target2 = _make_inputs(k2, B2, nfeat2, nclass2)
    # f32 matmul, tight tolerance: validates the tiled iota-offset epilogue.
    out2_f32 = arc_linear_forward(x2, W2, target2, margin=margin, s=scale,
                                  training=True, use_bf16_matmul=False,
                                  block_n=256)
    # bf16 MXU operands (default fast path), looser tolerance vs f32 reference.
    out2_bf16_tr = arc_linear_forward(x2, W2, target2, margin=margin, s=scale,
                                      training=True, use_bf16_matmul=True,
                                      block_n=256)
    out2_bf16_ev = arc_linear_forward(x2, W2, margin=margin, s=scale,
                                      training=False, use_bf16_matmul=True,
                                      block_n=256)
    jax.block_until_ready((out2_f32, out2_bf16_tr, out2_bf16_ev))
    ref2_tr = _reference(x2, W2, target2, margin, scale, True)
    ref2_ev = _reference(x2, W2, target2, margin, scale, False)
    assert jnp.allclose(out2_f32, ref2_tr, atol=1e-4, rtol=1e-4)
    assert jnp.allclose(out2_bf16_tr, ref2_tr, atol=0.3, rtol=2e-2)
    assert jnp.allclose(out2_bf16_ev, ref2_ev, atol=0.3, rtol=2e-2)

    print("KERNEL_OK")
</pallas_src>

<mosaic_0001>
module attributes {stable_mosaic.version = 11 : i64} {
  func.func @_arcface_train_kernel(%arg0: i32, %arg1: memref<8x32xf32, #tpu.memory_space<vmem>>, %arg2: memref<16x32xf32, #tpu.memory_space<vmem>>, %arg3: memref<8x1xi32, #tpu.memory_space<vmem>>, %arg4: memref<8x16xf32, #tpu.memory_space<vmem>>) attributes {dimension_semantics = [#tpu.dimension_semantics<parallel>], iteration_bounds = array<i64: 1>, scalar_prefetch = 0 : i64, scratch_operands = 0 : i64, tpu.core_type = #tpu.core_type<tc>, window_params = [{pipeline_mode = #tpu.pipeline_mode<synchronous>, transform_indices = @transform_0, window_bounds = array<i64: 8, 32>}, {transform_indices = @transform_1, window_bounds = array<i64: 16, 32>}, {pipeline_mode = #tpu.pipeline_mode<synchronous>, transform_indices = @transform_2, window_bounds = array<i64: 8, 1>}, {transform_indices = @transform_3, window_bounds = array<i64: 8, 16>}]} {
    %c0 = arith.constant 0 : index
    %c0_0 = arith.constant 0 : index
    %0 = vector.load %arg1[%c0, %c0_0] : memref<8x32xf32, #tpu.memory_space<vmem>>, vector<8x32xf32>
    %c0_1 = arith.constant 0 : index
    %c0_2 = arith.constant 0 : index
    %1 = vector.load %arg2[%c0_1, %c0_2] : memref<16x32xf32, #tpu.memory_space<vmem>>, vector<16x32xf32>
    %2 = arith.mulf %0, %0 : vector<8x32xf32>
    %cst = arith.constant dense<0.000000e+00> : vector<8xf32>
    %3 = vector.multi_reduction <add>, %2, %cst [1] : vector<8x32xf32> to vector<8xf32>
    %4 = vector.shape_cast %3 : vector<8xf32> to vector<8x1xf32>
    %cst_3 = arith.constant 1.000000e-24 : f32
    %5 = vector.broadcast %cst_3 : f32 to vector<8x1xf32>
    %6 = arith.maximumf %4, %5 : vector<8x1xf32>
    %7 = math.rsqrt %6 : vector<8x1xf32>
    %8 = vector.broadcast %7 : vector<8x1xf32> to vector<8x32xf32>
    %9 = arith.mulf %0, %8 : vector<8x32xf32>
    %10 = arith.mulf %1, %1 : vector<16x32xf32>
    %cst_4 = arith.constant dense<0.000000e+00> : vector<16xf32>
    %11 = vector.multi_reduction <add>, %10, %cst_4 [1] : vector<16x32xf32> to vector<16xf32>
    %12 = vector.shape_cast %11 : vector<16xf32> to vector<16x1xf32>
    %cst_5 = arith.constant 1.000000e-24 : f32
    %13 = vector.broadcast %cst_5 : f32 to vector<16x1xf32>
    %14 = arith.maximumf %12, %13 : vector<16x1xf32>
    %15 = math.rsqrt %14 : vector<16x1xf32>
    %16 = vector.broadcast %15 : vector<16x1xf32> to vector<16x32xf32>
    %17 = arith.mulf %1, %16 : vector<16x32xf32>
    %cst_6 = arith.constant dense<0.000000e+00> : vector<8x16xf32>
    %18 = tpu.matmul %9, %17, %cst_6 {dimension_numbers = #tpu.dot_dimension_numbers<[1], [1], [0], [0], [0, 0, 1, 0], [], []>} : vector<8x32xf32>, vector<16x32xf32>, vector<8x16xf32> -> vector<8x16xf32>
    %c0_7 = arith.constant 0 : index
    %c0_8 = arith.constant 0 : index
    %19 = vector.load %arg3[%c0_7, %c0_8] : memref<8x1xi32, #tpu.memory_space<vmem>>, vector<8x1xi32>
    %20 = tpu.iota {dimensions = array<i32: 1>} : vector<8x16xi32>
    %c16_i32 = arith.constant 16 : i32
    %21 = arith.muli %arg0, %c16_i32 : i32
    %22 = vector.broadcast %21 : i32 to vector<8x16xi32>
    %23 = arith.addi %20, %22 : vector<8x16xi32>
    %24 = vector.broadcast %19 : vector<8x1xi32> to vector<8x16xi32>
    %25 = arith.cmpi eq, %23, %24 : vector<8x16xi32>
    %cst_9 = arith.constant 0.000000e+00 : f32
    %26 = vector.broadcast %cst_9 : f32 to vector<8x16xf32>
    %27 = arith.select %25, %18, %26 : vector<8x16xi1>, vector<8x16xf32>
    %cst_10 = arith.constant dense<0.000000e+00> : vector<8xf32>
    %28 = vector.multi_reduction <add>, %27, %cst_10 [1] : vector<8x16xf32> to vector<8xf32>
    %29 = vector.shape_cast %28 : vector<8xf32> to vector<8x1xf32>
    %cst_11 = arith.constant -0.999899983 : f32
    %cst_12 = arith.constant 0.999899983 : f32
    %30 = vector.broadcast %cst_11 : f32 to vector<8x1xf32>
    %31 = arith.maximumf %30, %29 : vector<8x1xf32>
    %32 = vector.broadcast %cst_12 : f32 to vector<8x1xf32>
    %33 = arith.minimumf %32, %31 : vector<8x1xf32>
    %34 = arith.mulf %33, %33 : vector<8x1xf32>
    %cst_13 = arith.constant 1.000000e+00 : f32
    %35 = vector.broadcast %cst_13 : f32 to vector<8x1xf32>
    %36 = arith.subf %35, %34 : vector<8x1xf32>
    %cst_14 = arith.constant 0.000000e+00 : f32
    %37 = vector.broadcast %cst_14 : f32 to vector<8x1xf32>
    %38 = arith.maximumf %36, %37 : vector<8x1xf32>
    %39 = math.sqrt %38 : vector<8x1xf32>
    %cst_15 = arith.constant 0.87758255 : f32
    %40 = vector.broadcast %cst_15 : f32 to vector<8x1xf32>
    %41 = arith.mulf %33, %40 : vector<8x1xf32>
    %cst_16 = arith.constant 0.47942555 : f32
    %42 = vector.broadcast %cst_16 : f32 to vector<8x1xf32>
    %43 = arith.mulf %39, %42 : vector<8x1xf32>
    %44 = arith.subf %41, %43 : vector<8x1xf32>
    %45 = arith.subf %44, %33 : vector<8x1xf32>
    %46 = vector.broadcast %45 : vector<8x1xf32> to vector<8x16xf32>
    %47 = arith.addf %18, %46 : vector<8x16xf32>
    %48 = arith.select %25, %47, %18 : vector<8x16xi1>, vector<8x16xf32>
    %cst_17 = arith.constant 3.000000e+01 : f32
    %49 = vector.broadcast %cst_17 : f32 to vector<8x16xf32>
    %50 = arith.mulf %49, %48 : vector<8x16xf32>
    %c0_18 = arith.constant 0 : index
    %c0_19 = arith.constant 0 : index
    %51 = vector.load %arg4[%c0_18, %c0_19] : memref<8x16xf32, #tpu.memory_space<vmem>>, vector<8x16xf32>
    tpu.vector_store %arg4[%c0_18, %c0_19], %50 {strides = array<i32>} : memref<8x16xf32, #tpu.memory_space<vmem>>, vector<8x16xf32>,
    return
  }
  func.func @transform_0(%arg0: i32) -> (i32, i32) {
    %c0_i32 = arith.constant 0 : i32
    %c0_i32_0 = arith.constant 0 : i32
    %c0_i32_1 = arith.constant 0 : i32
    return %c0_i32, %c0_i32_0 : i32, i32
  }
  func.func @transform_1(%arg0: i32) -> (i32, i32) {
    %c0_i32 = arith.constant 0 : i32
    %c0_i32_0 = arith.constant 0 : i32
    return %arg0, %c0_i32 : i32, i32
  }
  func.func @transform_2(%arg0: i32) -> (i32, i32) {
    %c0_i32 = arith.constant 0 : i32
    %c0_i32_0 = arith.constant 0 : i32
    %c0_i32_1 = arith.constant 0 : i32
    return %c0_i32, %c0_i32_0 : i32, i32
  }
  func.func @transform_3(%arg0: i32) -> (i32, i32) {
    %c0_i32 = arith.constant 0 : i32
    %c0_i32_0 = arith.constant 0 : i32
    return %c0_i32, %arg0 : i32, i32
  }
}

</mosaic_0001>

<bundles_post_ra>
// kernel: tpu_custom_call.1
= control target key start
LH: loop header
LB: loop body
LE: loop exit
PB: predicated region body
PF: predicated region fallthrough
CT: control target
= control target key end

     0   :  { %8 = vsyncpa [#allocation3], 0  ;;  %s287_s0 = inlined_call_operand.vmem [shape: f32[8,32], index: 0, kind: input, shape index: {}]   ;;  %s288_s1 = inlined_call_operand.hbm [shape: f32[16,32], index: 1, kind: input, shape index: {}]   ;;  %s289_s2 = inlined_call_operand.vmem [shape: s32[8,1], index: 2, kind: input, shape index: {}]   ;;  %s290_s3 = inlined_call_operand.hbm [shape: f32[8,16], index: 3, kind: output, shape index: {}]  }
   0x1   :  { %9 = vsyncpa [#allocation4], 0  ;;  %s16_s14 = sshll.u32 %s288_s1, 4  ;;  %s240_s15 = smov [#allocation2]   ;;  %s17_s14 = int_to_ptr.hbm [resolvable:$true] %s16_s14 }
   0x2   :  { %s18_s16 = sshll.u32 %s240_s15, 4  ;;  %s241_s17 = smov 128   ;;  %s19_s16 = int_to_ptr.vmem [resolvable:$true] %s18_s16 }
   0x3   :  { %s242_s18 = smov 8  }
   0x4   :  { %24 = dma.hbm_to_vmem [thread:$0]  %s17_s14, 256, %s19_s16, [#allocation3], %s241_s17, %s241_s17, %s242_s18  }
   0x5   :  { %236 = dma.done.wait [#allocation3], 256  }
   0x6   :  { %237 = vsyncadd [#allocation3], 4294967040  ;;  %v33_v0 = vld [vmem:[#allocation2 + $0x8] sm:$0xff]  ;;  %vm35_vm0 = vcmask 261120   ;;  %v31_v1 = vld [vmem:[%s287_s0] sm:$0xff]  ;;  %v243_v14 = vmov 0   ;;  %v113_v41 = vlaneseq }
   0x7   :  { %v52_v2 = vmul.f32 %v33_v0, %v33_v0  ;;  %v34_v3 = vmul.f32 %v31_v1, %v31_v1  ;;  %v32_v4 = vld [vmem:[#allocation2] sm:$0xff]  ;;  %178 = vset.pattern.permute.xlu1 %v243_v14  ;;  %179 = vset.pattern.permute.xlu0 %v243_v14  ;;  %vm123_vm11 = vcmask 130048   ;;  %s244_s0 = smov [#allocation5]   ;;  %s159_s24 = sshll.u32 %s290_s3, 4  ;;  %s160_s24 = int_to_ptr.hbm [resolvable:$true] %s159_s24 }
   0x8   :  { %v51_v7 = vmul.f32 %v32_v4, %v32_v4  ;;  %v112_v13 = vld [vmem:[%s289_s2] sm:$0xff]  ;;  %v114_v42 = vand.u32 127, %v113_v41  ;;  %s157_s2 = sshll.u32 %s244_s0, 4  ;;  %s158_s2 = int_to_ptr.vmem [resolvable:$true] %s157_s2 }
   0x9   :  { %v56_v5 = vsel %vm35_vm0, %v52_v2, 0.0  ;;  %v36_v6 = vsel %vm35_vm0, %v34_v3, 0.0 }
   0xa   :  { %57 = vadd.xlane.f32.xlu0 %v56_v5  ;;  %37 = vadd.xlane.f32.xlu1 %v36_v6  ;;  %v53_v8 = vsel %vm35_vm0, %v51_v7, 0.0 }
  0x12   :  { %54 = vadd.xlane.f32.xlu0 %v53_v8 }
  0x23   :  { %119 = vperm.xlu1 %178, %v112_v13  }
  0x7d   :  { %v58_v9 = vpop.xlane.xlu0 %57  ;;  %v38_v10 = vpop.xlane.xlu1 %37 }
  0x7e   :  { %v60_v11 = vmax.f32 %v58_v9, 1e-24  ;;  %v39_v12 = vmax.f32 %v38_v10, 1e-24 }
  0x80   :  { %180 = vrsqrt.f32 %v60_v11  ;;  %vm77_vm2 = vweird.f32 %v60_v11  ;;  %vm46_vm5 = vweird.f32 %v39_v12 }
  0x81   :  { %182 = vrsqrt.f32 %v39_v12 }
  0x85   :  { %v55_v15 = vpop.xlane.xlu0 %54 }
  0x86   :  { %v181_v16 = vpop.eup %180  ;;  %v59_v17 = vmax.f32 %v55_v15, 1e-24 }
  0x87   :  { %v183_v18 = vpop.eup %182  ;;  %v72_v19 = vmul.f32 %v181_v16, %v60_v11  ;;  %vm78_vm1 = vweird.f32 %v181_v16 }
  0x88   :  { %v41_v20 = vmul.f32 %v183_v18, %v39_v12  ;;  %184 = vrsqrt.f32 %v59_v17  ;;  %vm79_vm3 = vmor %vm77_vm2, %vm78_vm1  ;;  %vm47_vm6 = vweird.f32 %v183_v18  ;;  %vm67_vm7 = vweird.f32 %v59_v17 }
  0x89   :  { %v73_v21 = vmul.f32 %v181_v16, %v72_v19  ;;  %vm48_vm9 = vmor %vm46_vm5, %vm47_vm6 }
  0x8a   :  { %v42_v22 = vmul.f32 %v183_v18, %v41_v20 }
  0x8b   :  { %v74_v23 = vmul.f32 0.5, %v73_v21 }
  0x8c   :  { %v43_v26 = vmul.f32 0.5, %v42_v22 }
  0x8d   :  { %v75_v24 = vsub.f32 1.5, %v74_v23 }
  0x8e   :  { %v185_v25 = vpop.eup %184  ;;  %v44_v31 = vsub.f32 1.5, %v43_v26 }
  0x8f   :  { %v62_v27 = vmul.f32 %v185_v25, %v59_v17  ;;  %v76_v28 = vmul.f32 %v181_v16, %v75_v24  ;;  %vm68_vm4 = vweird.f32 %v185_v25 }
  0x90   :  { %v45_v35 = vmul.f32 %v183_v18, %v44_v31  ;;  %vm69_vm8 = vmor %vm67_vm7, %vm68_vm4 }
  0x91   :  { %v63_v29 = vmul.f32 %v185_v25, %v62_v27  ;;  %v80_v30 = vsel %vm79_vm3, %v181_v16, %v76_v28 }
  0x92   :  { %v82_v32 = vmul.f32 %v80_v30, %v33_v0  ;;  %v49_v39 = vsel %vm48_vm9, %v183_v18, %v45_v35 }
  0x93   :  { %v64_v33 = vmul.f32 0.5, %v63_v29  ;;  %v50_v40 = vmul.f32 %v49_v39, %v31_v1 }
  0x94   :  { %169 = vmatpush.xpose.msk.msra.mxu0 %vm35_vm0, %v82_v32 }
  0x95   :  { %v65_v34 = vsub.f32 1.5, %v64_v33  ;;  %v120_v43 = vpop.permute.xlu1 %119 }
  0x96   :  { %vm121_vm10 = vcmp.eq.s32.totalorder %v114_v42, %v120_v43 }
  0x97   :  { %v66_v36 = vmul.f32 %v185_v25, %v65_v34 }
  0x99   :  { %v70_v37 = vsel %vm69_vm8, %v185_v25, %v66_v36 }
  0x9a   :  { %v81_v38 = vmul.f32 %v70_v37, %v32_v4 }
  0x9c   :  { %170 = vmatpush.xpose.msk.msra.mxu0 %vm35_vm0, %v81_v38 }
  0x9f   :  { %171 = vmatmul.msk.f32.vlgmr.msra.gmra.mxu0 %vm35_vm0, %v50_v40 }
 0x11c   :  { %v109_v44 = vpop.f32.mrf.mxu0 }
 0x11d   :  { %v122_v45 = vsel %vm121_vm10, %v109_v44, 0.0 }
 0x11e   :  { %v124_v46 = vsel %vm123_vm11, %v122_v45, 0.0 }
 0x11f   :  { %125 = vadd.xlane.f32.xlu2 %v124_v46 }
 0x192   :  { %v126_v47 = vpop.xlane.xlu2 %125 }
 0x193   :  { %v172_v48 = vclamps-f32 %v126_v47, 0.9999 }
 0x195   :  { %v129_v49 = vmul.f32 %v172_v48, %v172_v48  ;;  %v144_v62 = vmul.f32 0.87758255, %v172_v48 }
 0x197   :  { %v130_v50 = vsub.f32 1.0, %v129_v49 }
 0x199   :  { %v131_v51 = vmax.f32 %v130_v50, 0.0 }
 0x19b   :  { %186 = vrsqrt.f32 %v131_v51  ;;  %vm139_vm12 = vcmp.eq.f32.partialorder %v131_v51, inf  ;;  %v142_v59 = vand.u32 2147483648, %v131_v51  ;;  %vm141_vm13 = vcmp.eq.f32.partialorder %v131_v51, 0.0 }
 0x1a1   :  { %v187_v52 = vpop.eup %186 }
 0x1a2   :  { %v133_v53 = vmul.f32 %v187_v52, %v131_v51 }
 0x1a4   :  { %v134_v54 = vmul.f32 %v187_v52, %v133_v53 }
 0x1a6   :  { %v135_v55 = vmul.f32 0.5, %v134_v54 }
 0x1a8   :  { %v136_v56 = vsub.f32 1.5, %v135_v55 }
 0x1aa   :  { %v137_v57 = vmul.f32 %v187_v52, %v136_v56 }
 0x1ac   :  { %v138_v58 = vmul.f32 %v137_v57, %v131_v51 }
 0x1ae   :  { %v140_v60 = vsel %vm139_vm12, %v131_v51, %v138_v58 }
 0x1af   :  { %v143_v61 = vsel %vm141_vm13, %v142_v59, %v140_v60 }
 0x1b0   :  { %v145_v63 = vmul.f32 0.47942555, %v143_v61 }
 0x1b2   :  { %v146_v0 = vsub.f32 %v144_v62, %v145_v63 }
 0x1b4   :  { %v147_v1 = vsub.f32 %v146_v0, %v172_v48 }
 0x1b6   :  { %v148_v2 = vadd.f32 %v147_v1, %v109_v44 }
 0x1b8   :  { %v149_v3 = vsel %vm121_vm10, %v148_v2, %v109_v44 }
 0x1b9   :  { %v150_v4 = vmul.f32 30.0, %v149_v3 }
 0x1bb   :  { %151 = vst.msk [vmem:[#allocation5] sm:$0xff] %vm123_vm11, %v150_v4 }
 0x1bc   :  { %162 = dma.vmem_to_hbm [thread:$0]  %s158_s2, 128, %s160_s24, [#allocation4]  }
 0x1bd   :  { %238 = dma.done.wait [#allocation4], 128  }
 0x1be   :  { %239 = vsyncadd [#allocation4], 4294967168 }
 0x1bf   :  { %167 = vsyncpa [#allocation3], 1 }
 0x1c0   :  { %168 = vsyncpa [#allocation4], 1 }

</bundles_post_ra>
